<compile_context>
chip_gen: v7x
topology: tpu7x:2x2x1
jax: 0.10.0
libtpu: 0.0.40
codegen_flags: <defaults>
</compile_context>

<pallas_src>
import functools

import jax
import jax.numpy as jnp
from jax.experimental import pallas as pl
from jax.experimental.pallas import tpu as pltpu


# ----------------------------- hparams (synthetic) --------------------------

HPARAMS = dict(
    input_normalizing_constant=None,
    n_cg_blocks=2,
    do_initial_linear_projection=True,
    ch_initial_linear_projection=8,
    lmax_list=[1, 1],
    ch_size_list=[8, 16],
    ls_nonlin_rule_list=["full", "full"],
    ch_nonlin_rule_list=["elementwise", "elementwise"],
    use_additive_skip_connections=True,
    weights_initializer="default",
    use_batch_norm=False,
    norm_type=None,
    normalization="component",
    norm_balanced=False,
    norm_affine=True,
    norm_nonlinearity=None,
    norm_location="between",
    linearity_first=True,
    filter_symmetric=True,
    n_fc_blocks=2,
    fc_h_dim=32,
    fc_nonlin="silu",
    dropout_rate=0.0,
    use_batch_norm_in_fc=False,
    output_dim=5,
    conditioning_dim=6,
    conditioning_hidden_dim=8,
)


# ----------------------------- static helpers -------------------------------

def make_paths(lmax, filter_symmetric=True):
    """Parity-allowed CG paths (l1, l2, l3) with l1 <= l2 if filter_symmetric."""
    paths = []
    for l1 in range(lmax + 1):
        for l2 in range(l1 if filter_symmetric else 0, lmax + 1):
            for l3 in range(abs(l1 - l2), min(l1 + l2, lmax) + 1):
                if (l1 + l2 + l3) % 2 == 0:
                    paths.append((l1, l2, l3))
    return paths


def w3j_layout(hparams):
    """Flat SMEM layout (offsets) for all Wigner-3j blocks used by any CG block."""
    needed = set()
    for lmax in hparams["lmax_list"]:
        needed |= set(make_paths(lmax, hparams["filter_symmetric"]))
    order = sorted(needed)
    offsets, off = {}, 0
    for (l1, l2, l3) in order:
        offsets[(l1, l2, l3)] = off
        off += (2 * l1 + 1) * (2 * l2 + 1) * (2 * l3 + 1)
    return order, offsets, off


# ----------------------------- fused forward ---------------------------------

def forward(params, x, c, w3j, hparams):
    """Whole forward pass as a single fused Pallas kernel."""
    assert hparams["do_initial_linear_projection"]
    assert hparams["linearity_first"]
    # input_normalizing_constant is None for these hparams -> no runtime scaling.

    f32 = jnp.float32
    B = c.shape[0]
    # Batch tile sits on the lane axis: it must be a multiple of 128 or the
    # whole batch.  >=2 tiles additionally lets v7x shard across both TCs.
    TB = 128 if (B > 128 and B % 128 == 0) else B

    lmax_list = hparams["lmax_list"]
    ch_list = hparams["ch_size_list"]
    n_blocks = hparams["n_cg_blocks"]
    n_fc = hparams["n_fc_blocks"]
    ch_init = hparams["ch_initial_linear_projection"]
    out_dim = hparams["output_dim"]

    # --- static plan: live l's per stage (dead branches skipped) ---
    ls_model = list(range(lmax_list[0] + 1))
    ls_in = [l for l in ls_model if l in x]  # higher input l's are never consumed
    assert 0 in ls_in
    in_ch = {l: x[l].shape[1] for l in ls_in}

    path_order, w3j_off, _ = w3j_layout(hparams)
    w3j_flat = jnp.concatenate([w3j[p].reshape(-1).astype(f32) for p in path_order])

    lin_ls_list, paths_live_list = [], []
    ls_avail = list(ls_in)
    for i in range(n_blocks):
        last = i == n_blocks - 1
        lin_ls = [l for l in range(lmax_list[i] + 1) if l in ls_avail]
        paths = [p for p in make_paths(lmax_list[i], hparams["filter_symmetric"])
                 if p[0] in lin_ls and p[1] in lin_ls]
        ls_avail = sorted({p[2] for p in paths})
        if last:
            paths = [p for p in paths if p[2] == 0]  # only l=0 reaches the head
        lin_ls_list.append(lin_ls)
        paths_live_list.append(paths)
    assert 0 in ls_avail

    # --- pack ALL weights into one (8-row-aligned, 128-col) VMEM slab ---
    entries = []

    def add_w(name, a):
        entries.append((name, jnp.asarray(a, f32)))

    add_w("cond_w", params["cond_w"].T)
    add_w("cond_b", params["cond_b"].reshape(-1, 1))

    for l in ls_in:
        w, b = params["init_lin"][l]
        if l == 0:
            add_w("init0_x", w[: in_ch[0], :].T)   # rows acting on original l=0 chans
            add_w("init0_c", w[in_ch[0]:, :].T)    # rows acting on conditioning chans
            add_w("init0_b", b.reshape(-1, 1))
        else:
            add_w(f"init{l}_w", w.T)

    for i in range(n_blocks):
        lin = params["cg_blocks"][i]["lin"]
        for l in lin_ls_list[i]:
            w, b = lin[l]
            add_w(f"blk{i}_l{l}_w", w.T)
            if l == 0:
                add_w(f"blk{i}_l{l}_b", b.reshape(-1, 1))

    for j, (w, b) in enumerate(params["fc"]):
        add_w(f"fc{j}_w", w.T)
        add_w(f"fc{j}_b", b.reshape(-1, 1))
    add_w("out_w", params["out_w"].T)
    add_w("out_b", params["out_b"].reshape(-1, 1))

    WCOLS = 128
    woff, blocks, row = {}, [], 0
    for name, a in entries:
        r, cc = a.shape
        assert cc <= WCOLS
        woff[name] = (row, r, cc)
        rp = -(-r // 8) * 8                      # 8-row alignment per packed block
        blocks.append(jnp.zeros((rp, WCOLS), f32).at[:r, :cc].set(a))
        row += rp
    wslab = jnp.concatenate(blocks, axis=0)       # [total_rows, 128] f32

    # --- activations: batch on the lane (last) axis ---
    acts = [jnp.transpose(x[l], (2, 1, 0)).astype(f32) for l in ls_in]  # [2l+1, C, B]
    c_t = jnp.transpose(c, (1, 0)).astype(f32)                          # [cond, B]

    # ----------------------------- the fused kernel -----------------------------
    def kernel(w3j_ref, wslab_ref, *refs):
        it = iter(refs)

        def W(name):
            off, r, cc = woff[name]
            return wslab_ref[off:off + r, :cc]

        def dot(a, b):
            return jnp.dot(a, b, preferred_element_type=jnp.float32)

        # activations -> per-l lane-dense slabs [C, (2l+1)*TB] (m-major on lane)
        xs = {}
        for l in ls_in:
            r = next(it)
            m_n = 2 * l + 1
            xs[l] = r[0] if m_n == 1 else jnp.concatenate(
                [r[m] for m in range(m_n)], axis=-1)
        c_val = next(it)[...]
        out_ref = next(it)

        # conditioning projection (becomes extra l=0 channels)
        cp = dot(W("cond_w"), c_val) + W("cond_b")            # [hid, TB]

        # initial SO3 linearity (per-l channel mixing; bias on l=0 only)
        h = {}
        for l in ls_in:
            if l == 0:
                h[0] = dot(W("init0_x"), xs[0]) + dot(W("init0_c"), cp) + W("init0_b")
            else:
                h[l] = dot(W(f"init{l}_w"), xs[l])
        ch_prev = ch_init

        # CG blocks
        for i in range(n_blocks):
            ch = ch_list[i]

            # SO3 linearity: one MXU dot per l over all m at once
            g = {}
            for l in lin_ls_list[i]:
                gl = dot(W(f"blk{i}_l{l}_w"), h[l])
                if l == 0:
                    gl = gl + W(f"blk{i}_l{l}_b")
                g[l] = gl

            def gm(l, m):
                return g[l][:, m * TB:(m + 1) * TB]

            # channel-wise CG tensor product; products deduped per (l1,l2) pair
            pairs = sorted({(l1, l2) for (l1, l2, _l3) in paths_live_list[i]})
            prod = {}
            for (l1, l2) in pairs:
                for m1 in range(2 * l1 + 1):
                    for m2 in range(2 * l2 + 1):
                        prod[(l1, l2, m1, m2)] = gm(l1, m1) * gm(l2, m2)

            t_parts = {}
            for (l1, l2, l3) in paths_live_list[i]:
                m1n, m2n, m3n = 2 * l1 + 1, 2 * l2 + 1, 2 * l3 + 1
                base = w3j_off[(l1, l2, l3)]
                acc_list = t_parts.setdefault(l3, [None] * m3n)
                for m3 in range(m3n):
                    acc = acc_list[m3]
                    for m1 in range(m1n):
                        for m2 in range(m2n):
                            coef = w3j_ref[base + (m1 * m2n + m2) * m3n + m3]
                            term = coef * prod[(l1, l2, m1, m2)]
                            acc = term if acc is None else acc + term
                    acc_list[m3] = acc

            # assemble per-l slabs + additive skip (channel truncate / zero-pad)
            t = {}
            for l3, parts in t_parts.items():
                slab = parts[0] if len(parts) == 1 else jnp.concatenate(parts, axis=-1)
                if l3 in h:
                    prev = h[l3]
                    if ch_prev == ch:
                        slab = slab + prev
                    elif ch_prev > ch:
                        slab = slab + prev[:ch, :]
                    else:  # zero-pad previous channels (pure in-vreg, no scratch)
                        slab = slab + jnp.concatenate(
                            [prev, jnp.zeros((ch - ch_prev, prev.shape[-1]), f32)],
                            axis=0)
                t[l3] = slab
            h = t
            ch_prev = ch

        # invariants -> FC(+SiLU) stack -> output head, all lane-dense [*, TB]
        inv = h[0]
        for j in range(n_fc):
            y = dot(W(f"fc{j}_w"), inv) + W(f"fc{j}_b")
            inv = y * (1.0 / (1.0 + jnp.exp(-y)))            # exact SiLU
        out_ref[...] = dot(W("out_w"), inv) + W("out_b")     # [out_dim, TB]

    # --- BlockSpecs: one weight-slab operand, batch-tiled activations ---
    in_specs = [
        pl.BlockSpec(memory_space=pltpu.MemorySpace.SMEM),        # w3j scalars
        pl.BlockSpec(wslab.shape, lambda i: (0, 0)),              # packed weights
    ]
    for l in ls_in:
        in_specs.append(pl.BlockSpec((2 * l + 1, in_ch[l], TB), lambda i: (0, 0, i)))
    in_specs.append(pl.BlockSpec((c_t.shape[0], TB), lambda i: (0, i)))

    out_t = pl.pallas_call(
        kernel,
        out_shape=jax.ShapeDtypeStruct((out_dim, B), f32),
        grid=(pl.cdiv(B, TB),),
        in_specs=in_specs,
        out_specs=pl.BlockSpec((out_dim, TB), lambda i: (0, i)),
        compiler_params=pltpu.CompilerParams(
            dimension_semantics=("parallel",),   # lets v7x split batch tiles across TCs
        ),
    )(w3j_flat, wslab, *acts, c_t)

    return jnp.transpose(out_t, (1, 0))          # back to [B, out_dim]


# ----------------------------- parameter init --------------------------------

def _dense_init(key, fan_in, fan_out):
    # PyTorch nn.Linear default init: U(-1/sqrt(fan_in), 1/sqrt(fan_in))
    bound = 1.0 / float(fan_in) ** 0.5
    kw, kb = jax.random.split(key)
    w = jax.random.uniform(kw, (fan_in, fan_out), jnp.float32, -bound, bound)
    b = jax.random.uniform(kb, (fan_out,), jnp.float32, -bound, bound)
    return w, b


def init_params(key, hparams, mul_in):
    keys = iter(jax.random.split(key, 128))
    params = {}

    cw, cb = _dense_init(
        next(keys), hparams["conditioning_dim"], hparams["conditioning_hidden_dim"]
    )
    params["cond_w"], params["cond_b"] = cw, cb

    max_l = max(mul_in)
    cond_ch = dict(mul_in)
    cond_ch[0] = mul_in.get(0, 0) + hparams["conditioning_hidden_dim"]

    if hparams["do_initial_linear_projection"]:
        ch0 = hparams["ch_initial_linear_projection"]
        init_lin = {}
        for l in range(max_l + 1):
            if l in cond_ch:
                w, b = _dense_init(next(keys), cond_ch[l], ch0)
                init_lin[l] = (w, b if l == 0 else None)
        params["init_lin"] = init_lin
        prev_ch = {l: ch0 for l in init_lin}
    else:
        params["init_lin"] = {}
        prev_ch = cond_ch

    cg_blocks = []
    for i in range(hparams["n_cg_blocks"]):
        lmax_i = hparams["lmax_list"][i]
        ch_i = hparams["ch_size_list"][i]
        lin = {}
        for l in range(lmax_i + 1):
            if l in prev_ch:
                w, b = _dense_init(next(keys), prev_ch[l], ch_i)
                lin[l] = (w, b if l == 0 else None)
        cg_blocks.append({"lin": lin})
        prev_ch = {l: ch_i for l in range(lmax_i + 1)}
    params["cg_blocks"] = cg_blocks

    fc = []
    prev_dim = hparams["ch_size_list"][-1]  # invariants_dim
    for _ in range(hparams["n_fc_blocks"]):
        w, b = _dense_init(next(keys), prev_dim, hparams["fc_h_dim"])
        fc.append((w, b))
        prev_dim = hparams["fc_h_dim"]
    params["fc"] = fc

    ow, ob = _dense_init(next(keys), prev_dim, hparams["output_dim"])
    params["out_w"], params["out_b"] = ow, ob
    return params


def init_w3j(key, hparams):
    # w3j matrices are external inputs to the module; generated deterministically.
    needed = set()
    for lmax in hparams["lmax_list"]:
        needed |= set(make_paths(lmax, hparams["filter_symmetric"]))
    w3j = {}
    for i, (l1, l2, l3) in enumerate(sorted(needed)):
        k = jax.random.fold_in(key, i)
        w3j[(l1, l2, l3)] = 0.5 * jax.random.normal(
            k, (2 * l1 + 1, 2 * l2 + 1, 2 * l3 + 1), jnp.float32
        )
    return w3j


# ----------------------------- main -------------------------------------------

if __name__ == "__main__":
    key = jax.random.PRNGKey(0)
    k_x, k_c, k_p, k_w = jax.random.split(key, 4)

    B = 2
    mul_in = {0: 4, 1: 4, 2: 4}  # irreps_in: 4x0e + 4x1o + 4x2e

    x = {}
    xkeys = jax.random.split(k_x, len(mul_in))
    for i, l in enumerate(sorted(mul_in)):
        x[l] = jax.random.normal(xkeys[i], (B, mul_in[l], 2 * l + 1), jnp.float32)
    c = jax.random.normal(k_c, (B, HPARAMS["conditioning_dim"]), jnp.float32)

    params = init_params(k_p, HPARAMS, mul_in)
    w3j = init_w3j(k_w, HPARAMS)

    run = jax.jit(functools.partial(forward, w3j=w3j, hparams=HPARAMS))
    out = run(params, x, c)
    out = jax.block_until_ready(out)

    assert out.shape == (B, HPARAMS["output_dim"]), out.shape
    assert bool(jnp.all(jnp.isfinite(out)))
    print("KERNEL_OK")
</pallas_src>

<mosaic_0001>
module attributes {stable_mosaic.version = 11 : i64} {
  func.func @kernel(%arg0: i32, %arg1: memref<19xf32, #tpu.memory_space<smem>>, %arg2: memref<264x128xf32, #tpu.memory_space<vmem>>, %arg3: memref<1x4x2xf32, #tpu.memory_space<vmem>>, %arg4: memref<3x4x2xf32, #tpu.memory_space<vmem>>, %arg5: memref<6x2xf32, #tpu.memory_space<vmem>>, %arg6: memref<5x2xf32, #tpu.memory_space<vmem>>) attributes {dimension_semantics = [#tpu.dimension_semantics<parallel>], iteration_bounds = array<i64: 1>, scalar_prefetch = 0 : i64, scratch_operands = 0 : i64, tpu.core_type = #tpu.core_type<tc>, window_params = [{transform_indices = @transform_0, window_bounds = array<i64: 19>}, {pipeline_mode = #tpu.pipeline_mode<synchronous>, transform_indices = @transform_1, window_bounds = array<i64: 264, 128>}, {transform_indices = @transform_2, window_bounds = array<i64: 1, 4, 2>}, {transform_indices = @transform_3, window_bounds = array<i64: 3, 4, 2>}, {transform_indices = @transform_4, window_bounds = array<i64: 6, 2>}, {transform_indices = @transform_5, window_bounds = array<i64: 5, 2>}]} {
    %c0 = arith.constant 0 : index
    %c0_0 = arith.constant 0 : index
    %c0_1 = arith.constant 0 : index
    %0 = vector.load %arg3[%c0, %c0_0, %c0_1] : memref<1x4x2xf32, #tpu.memory_space<vmem>>, vector<1x4x2xf32>
    %1 = vector.shape_cast %0 : vector<1x4x2xf32> to vector<4x2xf32>
    %c0_2 = arith.constant 0 : index
    %c0_3 = arith.constant 0 : index
    %c0_4 = arith.constant 0 : index
    %2 = vector.load %arg4[%c0_2, %c0_3, %c0_4] : memref<3x4x2xf32, #tpu.memory_space<vmem>>, vector<1x4x2xf32>
    %3 = vector.shape_cast %2 : vector<1x4x2xf32> to vector<4x2xf32>
    %c1 = arith.constant 1 : index
    %c0_5 = arith.constant 0 : index
    %c0_6 = arith.constant 0 : index
    %4 = vector.load %arg4[%c1, %c0_5, %c0_6] : memref<3x4x2xf32, #tpu.memory_space<vmem>>, vector<1x4x2xf32>
    %5 = vector.shape_cast %4 : vector<1x4x2xf32> to vector<4x2xf32>
    %c2 = arith.constant 2 : index
    %c0_7 = arith.constant 0 : index
    %c0_8 = arith.constant 0 : index
    %6 = vector.load %arg4[%c2, %c0_7, %c0_8] : memref<3x4x2xf32, #tpu.memory_space<vmem>>, vector<1x4x2xf32>
    %7 = vector.shape_cast %6 : vector<1x4x2xf32> to vector<4x2xf32>
    %8 = tpu.concatenate %3, %5, %7 in 1 : vector<4x2xf32>, vector<4x2xf32>, vector<4x2xf32> -> vector<4x6xf32>
    %c0_9 = arith.constant 0 : index
    %c0_10 = arith.constant 0 : index
    %9 = vector.load %arg5[%c0_9, %c0_10] : memref<6x2xf32, #tpu.memory_space<vmem>>, vector<6x2xf32>
    %c0_11 = arith.constant 0 : index
    %c0_12 = arith.constant 0 : index
    %10 = vector.load %arg2[%c0_11, %c0_12] : memref<264x128xf32, #tpu.memory_space<vmem>>, vector<8x6xf32>
    %cst = arith.constant dense<0.000000e+00> : vector<8x2xf32>
    %11 = tpu.matmul %10, %9, %cst {dimension_numbers = #tpu.dot_dimension_numbers<[1], [0], [0], [1], [0, 0, 1, 1], [], []>} : vector<8x6xf32>, vector<6x2xf32>, vector<8x2xf32> -> vector<8x2xf32>
    %c8 = arith.constant 8 : index
    %c0_13 = arith.constant 0 : index
    %12 = vector.load %arg2[%c8, %c0_13] : memref<264x128xf32, #tpu.memory_space<vmem>>, vector<8x1xf32>
    %13 = vector.broadcast %12 : vector<8x1xf32> to vector<8x2xf32>
    %14 = arith.addf %11, %13 : vector<8x2xf32>
    %c16 = arith.constant 16 : index
    %c0_14 = arith.constant 0 : index
    %15 = vector.load %arg2[%c16, %c0_14] : memref<264x128xf32, #tpu.memory_space<vmem>>, vector<8x4xf32>
    %cst_15 = arith.constant dense<0.000000e+00> : vector<8x2xf32>
    %16 = tpu.matmul %15, %1, %cst_15 {dimension_numbers = #tpu.dot_dimension_numbers<[1], [0], [0], [1], [0, 0, 1, 1], [], []>} : vector<8x4xf32>, vector<4x2xf32>, vector<8x2xf32> -> vector<8x2xf32>
    %c24 = arith.constant 24 : index
    %c0_16 = arith.constant 0 : index
    %17 = vector.load %arg2[%c24, %c0_16] : memref<264x128xf32, #tpu.memory_space<vmem>>, vector<8x8xf32>
    %cst_17 = arith.constant dense<0.000000e+00> : vector<8x2xf32>
    %18 = tpu.matmul %17, %14, %cst_17 {dimension_numbers = #tpu.dot_dimension_numbers<[1], [0], [0], [1], [0, 0, 1, 1], [], []>} : vector<8x8xf32>, vector<8x2xf32>, vector<8x2xf32> -> vector<8x2xf32>
    %19 = arith.addf %16, %18 : vector<8x2xf32>
    %c32 = arith.constant 32 : index
    %c0_18 = arith.constant 0 : index
    %20 = vector.load %arg2[%c32, %c0_18] : memref<264x128xf32, #tpu.memory_space<vmem>>, vector<8x1xf32>
    %21 = vector.broadcast %20 : vector<8x1xf32> to vector<8x2xf32>
    %22 = arith.addf %19, %21 : vector<8x2xf32>
    %c40 = arith.constant 40 : index
    %c0_19 = arith.constant 0 : index
    %23 = vector.load %arg2[%c40, %c0_19] : memref<264x128xf32, #tpu.memory_space<vmem>>, vector<8x4xf32>
    %cst_20 = arith.constant dense<0.000000e+00> : vector<8x6xf32>
    %24 = tpu.matmul %23, %8, %cst_20 {dimension_numbers = #tpu.dot_dimension_numbers<[1], [0], [0], [1], [0, 0, 1, 1], [], []>} : vector<8x4xf32>, vector<4x6xf32>, vector<8x6xf32> -> vector<8x6xf32>
    %c48 = arith.constant 48 : index
    %c0_21 = arith.constant 0 : index
    %25 = vector.load %arg2[%c48, %c0_21] : memref<264x128xf32, #tpu.memory_space<vmem>>, vector<8x8xf32>
    %cst_22 = arith.constant dense<0.000000e+00> : vector<8x2xf32>
    %26 = tpu.matmul %25, %22, %cst_22 {dimension_numbers = #tpu.dot_dimension_numbers<[1], [0], [0], [1], [0, 0, 1, 1], [], []>} : vector<8x8xf32>, vector<8x2xf32>, vector<8x2xf32> -> vector<8x2xf32>
    %c56 = arith.constant 56 : index
    %c0_23 = arith.constant 0 : index
    %27 = vector.load %arg2[%c56, %c0_23] : memref<264x128xf32, #tpu.memory_space<vmem>>, vector<8x1xf32>
    %28 = vector.broadcast %27 : vector<8x1xf32> to vector<8x2xf32>
    %29 = arith.addf %26, %28 : vector<8x2xf32>
    %c64 = arith.constant 64 : index
    %c0_24 = arith.constant 0 : index
    %30 = vector.load %arg2[%c64, %c0_24] : memref<264x128xf32, #tpu.memory_space<vmem>>, vector<8x8xf32>
    %cst_25 = arith.constant dense<0.000000e+00> : vector<8x6xf32>
    %31 = tpu.matmul %30, %24, %cst_25 {dimension_numbers = #tpu.dot_dimension_numbers<[1], [0], [0], [1], [0, 0, 1, 1], [], []>} : vector<8x8xf32>, vector<8x6xf32>, vector<8x6xf32> -> vector<8x6xf32>
    %32 = arith.mulf %29, %29 : vector<8x2xf32>
    %33 = vector.extract_strided_slice %31 {offsets = [0, 0], sizes = [8, 2], strides = [1, 1]} : vector<8x6xf32> to vector<8x2xf32>
    %34 = arith.mulf %29, %33 : vector<8x2xf32>
    %35 = vector.extract_strided_slice %31 {offsets = [0, 2], sizes = [8, 2], strides = [1, 1]} : vector<8x6xf32> to vector<8x2xf32>
    %36 = arith.mulf %29, %35 : vector<8x2xf32>
    %37 = vector.extract_strided_slice %31 {offsets = [0, 4], sizes = [8, 2], strides = [1, 1]} : vector<8x6xf32> to vector<8x2xf32>
    %38 = arith.mulf %29, %37 : vector<8x2xf32>
    %39 = vector.extract_strided_slice %31 {offsets = [0, 0], sizes = [8, 2], strides = [1, 1]} : vector<8x6xf32> to vector<8x2xf32>
    %40 = vector.extract_strided_slice %31 {offsets = [0, 0], sizes = [8, 2], strides = [1, 1]} : vector<8x6xf32> to vector<8x2xf32>
    %41 = arith.mulf %39, %40 : vector<8x2xf32>
    %42 = vector.extract_strided_slice %31 {offsets = [0, 0], sizes = [8, 2], strides = [1, 1]} : vector<8x6xf32> to vector<8x2xf32>
    %43 = vector.extract_strided_slice %31 {offsets = [0, 2], sizes = [8, 2], strides = [1, 1]} : vector<8x6xf32> to vector<8x2xf32>
    %44 = arith.mulf %42, %43 : vector<8x2xf32>
    %45 = vector.extract_strided_slice %31 {offsets = [0, 0], sizes = [8, 2], strides = [1, 1]} : vector<8x6xf32> to vector<8x2xf32>
    %46 = vector.extract_strided_slice %31 {offsets = [0, 4], sizes = [8, 2], strides = [1, 1]} : vector<8x6xf32> to vector<8x2xf32>
    %47 = arith.mulf %45, %46 : vector<8x2xf32>
    %48 = vector.extract_strided_slice %31 {offsets = [0, 2], sizes = [8, 2], strides = [1, 1]} : vector<8x6xf32> to vector<8x2xf32>
    %49 = vector.extract_strided_slice %31 {offsets = [0, 0], sizes = [8, 2], strides = [1, 1]} : vector<8x6xf32> to vector<8x2xf32>
    %50 = arith.mulf %48, %49 : vector<8x2xf32>
    %51 = vector.extract_strided_slice %31 {offsets = [0, 2], sizes = [8, 2], strides = [1, 1]} : vector<8x6xf32> to vector<8x2xf32>
    %52 = vector.extract_strided_slice %31 {offsets = [0, 2], sizes = [8, 2], strides = [1, 1]} : vector<8x6xf32> to vector<8x2xf32>
    %53 = arith.mulf %51, %52 : vector<8x2xf32>
    %54 = vector.extract_strided_slice %31 {offsets = [0, 2], sizes = [8, 2], strides = [1, 1]} : vector<8x6xf32> to vector<8x2xf32>
    %55 = vector.extract_strided_slice %31 {offsets = [0, 4], sizes = [8, 2], strides = [1, 1]} : vector<8x6xf32> to vector<8x2xf32>
    %56 = arith.mulf %54, %55 : vector<8x2xf32>
    %57 = vector.extract_strided_slice %31 {offsets = [0, 4], sizes = [8, 2], strides = [1, 1]} : vector<8x6xf32> to vector<8x2xf32>
    %58 = vector.extract_strided_slice %31 {offsets = [0, 0], sizes = [8, 2], strides = [1, 1]} : vector<8x6xf32> to vector<8x2xf32>
    %59 = arith.mulf %57, %58 : vector<8x2xf32>
    %60 = vector.extract_strided_slice %31 {offsets = [0, 4], sizes = [8, 2], strides = [1, 1]} : vector<8x6xf32> to vector<8x2xf32>
    %61 = vector.extract_strided_slice %31 {offsets = [0, 2], sizes = [8, 2], strides = [1, 1]} : vector<8x6xf32> to vector<8x2xf32>
    %62 = arith.mulf %60, %61 : vector<8x2xf32>
    %63 = vector.extract_strided_slice %31 {offsets = [0, 4], sizes = [8, 2], strides = [1, 1]} : vector<8x6xf32> to vector<8x2xf32>
    %64 = vector.extract_strided_slice %31 {offsets = [0, 4], sizes = [8, 2], strides = [1, 1]} : vector<8x6xf32> to vector<8x2xf32>
    %65 = arith.mulf %63, %64 : vector<8x2xf32>
    %c0_26 = arith.constant 0 : index
    %66 = memref.load %arg1[%c0_26] : memref<19xf32, #tpu.memory_space<smem>>
    %67 = vector.broadcast %66 : f32 to vector<8x2xf32>
    %68 = arith.mulf %67, %32 : vector<8x2xf32>
    %c1_27 = arith.constant 1 : index
    %69 = memref.load %arg1[%c1_27] : memref<19xf32, #tpu.memory_space<smem>>
    %70 = vector.broadcast %69 : f32 to vector<8x2xf32>
    %71 = arith.mulf %70, %34 : vector<8x2xf32>
    %c4 = arith.constant 4 : index
    %72 = memref.load %arg1[%c4] : memref<19xf32, #tpu.memory_space<smem>>
    %73 = vector.broadcast %72 : f32 to vector<8x2xf32>
    %74 = arith.mulf %73, %36 : vector<8x2xf32>
    %75 = arith.addf %71, %74 : vector<8x2xf32>
    %c7 = arith.constant 7 : index
    %76 = memref.load %arg1[%c7] : memref<19xf32, #tpu.memory_space<smem>>
    %77 = vector.broadcast %76 : f32 to vector<8x2xf32>
    %78 = arith.mulf %77, %38 : vector<8x2xf32>
    %79 = arith.addf %75, %78 : vector<8x2xf32>
    %c2_28 = arith.constant 2 : index
    %80 = memref.load %arg1[%c2_28] : memref<19xf32, #tpu.memory_space<smem>>
    %81 = vector.broadcast %80 : f32 to vector<8x2xf32>
    %82 = arith.mulf %81, %34 : vector<8x2xf32>
    %c5 = arith.constant 5 : index
    %83 = memref.load %arg1[%c5] : memref<19xf32, #tpu.memory_space<smem>>
    %84 = vector.broadcast %83 : f32 to vector<8x2xf32>
    %85 = arith.mulf %84, %36 : vector<8x2xf32>
    %86 = arith.addf %82, %85 : vector<8x2xf32>
    %c8_29 = arith.constant 8 : index
    %87 = memref.load %arg1[%c8_29] : memref<19xf32, #tpu.memory_space<smem>>
    %88 = vector.broadcast %87 : f32 to vector<8x2xf32>
    %89 = arith.mulf %88, %38 : vector<8x2xf32>
    %90 = arith.addf %86, %89 : vector<8x2xf32>
    %c3 = arith.constant 3 : index
    %91 = memref.load %arg1[%c3] : memref<19xf32, #tpu.memory_space<smem>>
    %92 = vector.broadcast %91 : f32 to vector<8x2xf32>
    %93 = arith.mulf %92, %34 : vector<8x2xf32>
    %c6 = arith.constant 6 : index
    %94 = memref.load %arg1[%c6] : memref<19xf32, #tpu.memory_space<smem>>
    %95 = vector.broadcast %94 : f32 to vector<8x2xf32>
    %96 = arith.mulf %95, %36 : vector<8x2xf32>
    %97 = arith.addf %93, %96 : vector<8x2xf32>
    %c9 = arith.constant 9 : index
    %98 = memref.load %arg1[%c9] : memref<19xf32, #tpu.memory_space<smem>>
    %99 = vector.broadcast %98 : f32 to vector<8x2xf32>
    %100 = arith.mulf %99, %38 : vector<8x2xf32>
    %101 = arith.addf %97, %100 : vector<8x2xf32>
    %c10 = arith.constant 10 : index
    %102 = memref.load %arg1[%c10] : memref<19xf32, #tpu.memory_space<smem>>
    %103 = vector.broadcast %102 : f32 to vector<8x2xf32>
    %104 = arith.mulf %103, %41 : vector<8x2xf32>
    %105 = arith.addf %68, %104 : vector<8x2xf32>
    %c11 = arith.constant 11 : index
    %106 = memref.load %arg1[%c11] : memref<19xf32, #tpu.memory_space<smem>>
    %107 = vector.broadcast %106 : f32 to vector<8x2xf32>
    %108 = arith.mulf %107, %44 : vector<8x2xf32>
    %109 = arith.addf %105, %108 : vector<8x2xf32>
    %c12 = arith.constant 12 : index
    %110 = memref.load %arg1[%c12] : memref<19xf32, #tpu.memory_space<smem>>
    %111 = vector.broadcast %110 : f32 to vector<8x2xf32>
    %112 = arith.mulf %111, %47 : vector<8x2xf32>
    %113 = arith.addf %109, %112 : vector<8x2xf32>
    %c13 = arith.constant 13 : index
    %114 = memref.load %arg1[%c13] : memref<19xf32, #tpu.memory_space<smem>>
    %115 = vector.broadcast %114 : f32 to vector<8x2xf32>
    %116 = arith.mulf %115, %50 : vector<8x2xf32>
    %117 = arith.addf %113, %116 : vector<8x2xf32>
    %c14 = arith.constant 14 : index
    %118 = memref.load %arg1[%c14] : memref<19xf32, #tpu.memory_space<smem>>
    %119 = vector.broadcast %118 : f32 to vector<8x2xf32>
    %120 = arith.mulf %119, %53 : vector<8x2xf32>
    %121 = arith.addf %117, %120 : vector<8x2xf32>
    %c15 = arith.constant 15 : index
    %122 = memref.load %arg1[%c15] : memref<19xf32, #tpu.memory_space<smem>>
    %123 = vector.broadcast %122 : f32 to vector<8x2xf32>
    %124 = arith.mulf %123, %56 : vector<8x2xf32>
    %125 = arith.addf %121, %124 : vector<8x2xf32>
    %c16_30 = arith.constant 16 : index
    %126 = memref.load %arg1[%c16_30] : memref<19xf32, #tpu.memory_space<smem>>
    %127 = vector.broadcast %126 : f32 to vector<8x2xf32>
    %128 = arith.mulf %127, %59 : vector<8x2xf32>
    %129 = arith.addf %125, %128 : vector<8x2xf32>
    %c17 = arith.constant 17 : index
    %130 = memref.load %arg1[%c17] : memref<19xf32, #tpu.memory_space<smem>>
    %131 = vector.broadcast %130 : f32 to vector<8x2xf32>
    %132 = arith.mulf %131, %62 : vector<8x2xf32>
    %133 = arith.addf %129, %132 : vector<8x2xf32>
    %c18 = arith.constant 18 : index
    %134 = memref.load %arg1[%c18] : memref<19xf32, #tpu.memory_space<smem>>
    %135 = vector.broadcast %134 : f32 to vector<8x2xf32>
    %136 = arith.mulf %135, %65 : vector<8x2xf32>
    %137 = arith.addf %133, %136 : vector<8x2xf32>
    %138 = arith.addf %137, %22 : vector<8x2xf32>
    %139 = tpu.concatenate %79, %90, %101 in 1 : vector<8x2xf32>, vector<8x2xf32>, vector<8x2xf32> -> vector<8x6xf32>
    %140 = arith.addf %139, %24 : vector<8x6xf32>
    %c72 = arith.constant 72 : index
    %c0_31 = arith.constant 0 : index
    %141 = vector.load %arg2[%c72, %c0_31] : memref<264x128xf32, #tpu.memory_space<vmem>>, vector<16x8xf32>
    %cst_32 = arith.constant dense<0.000000e+00> : vector<16x2xf32>
    %142 = tpu.matmul %141, %138, %cst_32 {dimension_numbers = #tpu.dot_dimension_numbers<[1], [0], [0], [1], [0, 0, 1, 1], [], []>} : vector<16x8xf32>, vector<8x2xf32>, vector<16x2xf32> -> vector<16x2xf32>
    %c88 = arith.constant 88 : index
    %c0_33 = arith.constant 0 : index
    %143 = vector.load %arg2[%c88, %c0_33] : memref<264x128xf32, #tpu.memory_space<vmem>>, vector<16x1xf32>
    %144 = vector.broadcast %143 : vector<16x1xf32> to vector<16x2xf32>
    %145 = arith.addf %142, %144 : vector<16x2xf32>
    %c104 = arith.constant 104 : index
    %c0_34 = arith.constant 0 : index
    %146 = vector.load %arg2[%c104, %c0_34] : memref<264x128xf32, #tpu.memory_space<vmem>>, vector<16x8xf32>
    %cst_35 = arith.constant dense<0.000000e+00> : vector<16x6xf32>
    %147 = tpu.matmul %146, %140, %cst_35 {dimension_numbers = #tpu.dot_dimension_numbers<[1], [0], [0], [1], [0, 0, 1, 1], [], []>} : vector<16x8xf32>, vector<8x6xf32>, vector<16x6xf32> -> vector<16x6xf32>
    %148 = arith.mulf %145, %145 : vector<16x2xf32>
    %149 = vector.extract_strided_slice %147 {offsets = [0, 0], sizes = [16, 2], strides = [1, 1]} : vector<16x6xf32> to vector<16x2xf32>
    %150 = vector.extract_strided_slice %147 {offsets = [0, 0], sizes = [16, 2], strides = [1, 1]} : vector<16x6xf32> to vector<16x2xf32>
    %151 = arith.mulf %149, %150 : vector<16x2xf32>
    %152 = vector.extract_strided_slice %147 {offsets = [0, 0], sizes = [16, 2], strides = [1, 1]} : vector<16x6xf32> to vector<16x2xf32>
    %153 = vector.extract_strided_slice %147 {offsets = [0, 2], sizes = [16, 2], strides = [1, 1]} : vector<16x6xf32> to vector<16x2xf32>
    %154 = arith.mulf %152, %153 : vector<16x2xf32>
    %155 = vector.extract_strided_slice %147 {offsets = [0, 0], sizes = [16, 2], strides = [1, 1]} : vector<16x6xf32> to vector<16x2xf32>
    %156 = vector.extract_strided_slice %147 {offsets = [0, 4], sizes = [16, 2], strides = [1, 1]} : vector<16x6xf32> to vector<16x2xf32>
    %157 = arith.mulf %155, %156 : vector<16x2xf32>
    %158 = vector.extract_strided_slice %147 {offsets = [0, 2], sizes = [16, 2], strides = [1, 1]} : vector<16x6xf32> to vector<16x2xf32>
    %159 = vector.extract_strided_slice %147 {offsets = [0, 0], sizes = [16, 2], strides = [1, 1]} : vector<16x6xf32> to vector<16x2xf32>
    %160 = arith.mulf %158, %159 : vector<16x2xf32>
    %161 = vector.extract_strided_slice %147 {offsets = [0, 2], sizes = [16, 2], strides = [1, 1]} : vector<16x6xf32> to vector<16x2xf32>
    %162 = vector.extract_strided_slice %147 {offsets = [0, 2], sizes = [16, 2], strides = [1, 1]} : vector<16x6xf32> to vector<16x2xf32>
    %163 = arith.mulf %161, %162 : vector<16x2xf32>
    %164 = vector.extract_strided_slice %147 {offsets = [0, 2], sizes = [16, 2], strides = [1, 1]} : vector<16x6xf32> to vector<16x2xf32>
    %165 = vector.extract_strided_slice %147 {offsets = [0, 4], sizes = [16, 2], strides = [1, 1]} : vector<16x6xf32> to vector<16x2xf32>
    %166 = arith.mulf %164, %165 : vector<16x2xf32>
    %167 = vector.extract_strided_slice %147 {offsets = [0, 4], sizes = [16, 2], strides = [1, 1]} : vector<16x6xf32> to vector<16x2xf32>
    %168 = vector.extract_strided_slice %147 {offsets = [0, 0], sizes = [16, 2], strides = [1, 1]} : vector<16x6xf32> to vector<16x2xf32>
    %169 = arith.mulf %167, %168 : vector<16x2xf32>
    %170 = vector.extract_strided_slice %147 {offsets = [0, 4], sizes = [16, 2], strides = [1, 1]} : vector<16x6xf32> to vector<16x2xf32>
    %171 = vector.extract_strided_slice %147 {offsets = [0, 2], sizes = [16, 2], strides = [1, 1]} : vector<16x6xf32> to vector<16x2xf32>
    %172 = arith.mulf %170, %171 : vector<16x2xf32>
    %173 = vector.extract_strided_slice %147 {offsets = [0, 4], sizes = [16, 2], strides = [1, 1]} : vector<16x6xf32> to vector<16x2xf32>
    %174 = vector.extract_strided_slice %147 {offsets = [0, 4], sizes = [16, 2], strides = [1, 1]} : vector<16x6xf32> to vector<16x2xf32>
    %175 = arith.mulf %173, %174 : vector<16x2xf32>
    %c0_36 = arith.constant 0 : index
    %176 = memref.load %arg1[%c0_36] : memref<19xf32, #tpu.memory_space<smem>>
    %177 = vector.broadcast %176 : f32 to vector<16x2xf32>
    %178 = arith.mulf %177, %148 : vector<16x2xf32>
    %c10_37 = arith.constant 10 : index
    %179 = memref.load %arg1[%c10_37] : memref<19xf32, #tpu.memory_space<smem>>
    %180 = vector.broadcast %179 : f32 to vector<16x2xf32>
    %181 = arith.mulf %180, %151 : vector<16x2xf32>
    %182 = arith.addf %178, %181 : vector<16x2xf32>
    %c11_38 = arith.constant 11 : index
    %183 = memref.load %arg1[%c11_38] : memref<19xf32, #tpu.memory_space<smem>>
    %184 = vector.broadcast %183 : f32 to vector<16x2xf32>
    %185 = arith.mulf %184, %154 : vector<16x2xf32>
    %186 = arith.addf %182, %185 : vector<16x2xf32>
    %c12_39 = arith.constant 12 : index
    %187 = memref.load %arg1[%c12_39] : memref<19xf32, #tpu.memory_space<smem>>
    %188 = vector.broadcast %187 : f32 to vector<16x2xf32>
    %189 = arith.mulf %188, %157 : vector<16x2xf32>
    %190 = arith.addf %186, %189 : vector<16x2xf32>
    %c13_40 = arith.constant 13 : index
    %191 = memref.load %arg1[%c13_40] : memref<19xf32, #tpu.memory_space<smem>>
    %192 = vector.broadcast %191 : f32 to vector<16x2xf32>
    %193 = arith.mulf %192, %160 : vector<16x2xf32>
    %194 = arith.addf %190, %193 : vector<16x2xf32>
    %c14_41 = arith.constant 14 : index
    %195 = memref.load %arg1[%c14_41] : memref<19xf32, #tpu.memory_space<smem>>
    %196 = vector.broadcast %195 : f32 to vector<16x2xf32>
    %197 = arith.mulf %196, %163 : vector<16x2xf32>
    %198 = arith.addf %194, %197 : vector<16x2xf32>
    %c15_42 = arith.constant 15 : index
    %199 = memref.load %arg1[%c15_42] : memref<19xf32, #tpu.memory_space<smem>>
    %200 = vector.broadcast %199 : f32 to vector<16x2xf32>
    %201 = arith.mulf %200, %166 : vector<16x2xf32>
    %202 = arith.addf %198, %201 : vector<16x2xf32>
    %c16_43 = arith.constant 16 : index
    %203 = memref.load %arg1[%c16_43] : memref<19xf32, #tpu.memory_space<smem>>
    %204 = vector.broadcast %203 : f32 to vector<16x2xf32>
    %205 = arith.mulf %204, %169 : vector<16x2xf32>
    %206 = arith.addf %202, %205 : vector<16x2xf32>
    %c17_44 = arith.constant 17 : index
    %207 = memref.load %arg1[%c17_44] : memref<19xf32, #tpu.memory_space<smem>>
    %208 = vector.broadcast %207 : f32 to vector<16x2xf32>
    %209 = arith.mulf %208, %172 : vector<16x2xf32>
    %210 = arith.addf %206, %209 : vector<16x2xf32>
    %c18_45 = arith.constant 18 : index
    %211 = memref.load %arg1[%c18_45] : memref<19xf32, #tpu.memory_space<smem>>
    %212 = vector.broadcast %211 : f32 to vector<16x2xf32>
    %213 = arith.mulf %212, %175 : vector<16x2xf32>
    %214 = arith.addf %210, %213 : vector<16x2xf32>
    %cst_46 = arith.constant 0.000000e+00 : f32
    %215 = vector.broadcast %cst_46 : f32 to vector<8x2xf32>
    %216 = tpu.concatenate %138, %215 in 0 : vector<8x2xf32>, vector<8x2xf32> -> vector<16x2xf32>
    %217 = arith.addf %214, %216 : vector<16x2xf32>
    %c120 = arith.constant 120 : index
    %c0_47 = arith.constant 0 : index
    %218 = vector.load %arg2[%c120, %c0_47] : memref<264x128xf32, #tpu.memory_space<vmem>>, vector<32x16xf32>
    %cst_48 = arith.constant dense<0.000000e+00> : vector<32x2xf32>
    %219 = tpu.matmul %218, %217, %cst_48 {dimension_numbers = #tpu.dot_dimension_numbers<[1], [0], [0], [1], [0, 0, 1, 1], [], []>} : vector<32x16xf32>, vector<16x2xf32>, vector<32x2xf32> -> vector<32x2xf32>
    %c152 = arith.constant 152 : index
    %c0_49 = arith.constant 0 : index
    %220 = vector.load %arg2[%c152, %c0_49] : memref<264x128xf32, #tpu.memory_space<vmem>>, vector<32x1xf32>
    %221 = vector.broadcast %220 : vector<32x1xf32> to vector<32x2xf32>
    %222 = arith.addf %219, %221 : vector<32x2xf32>
    %cst_50 = arith.constant 0.000000e+00 : f32
    %223 = vector.broadcast %cst_50 : f32 to vector<32x2xf32>
    %224 = arith.subf %223, %222 : vector<32x2xf32>
    %225 = math.exp %224 : vector<32x2xf32>
    %cst_51 = arith.constant 1.000000e+00 : f32
    %226 = vector.broadcast %cst_51 : f32 to vector<32x2xf32>
    %227 = arith.addf %226, %225 : vector<32x2xf32>
    %cst_52 = arith.constant 1.000000e+00 : f32
    %228 = vector.broadcast %cst_52 : f32 to vector<32x2xf32>
    %229 = arith.divf %228, %227 : vector<32x2xf32>
    %230 = arith.mulf %222, %229 : vector<32x2xf32>
    %c184 = arith.constant 184 : index
    %c0_53 = arith.constant 0 : index
    %231 = vector.load %arg2[%c184, %c0_53] : memref<264x128xf32, #tpu.memory_space<vmem>>, vector<32x32xf32>
    %cst_54 = arith.constant dense<0.000000e+00> : vector<32x2xf32>
    %232 = tpu.matmul %231, %230, %cst_54 {dimension_numbers = #tpu.dot_dimension_numbers<[1], [0], [0], [1], [0, 0, 1, 1], [], []>} : vector<32x32xf32>, vector<32x2xf32>, vector<32x2xf32> -> vector<32x2xf32>
    %c216 = arith.constant 216 : index
    %c0_55 = arith.constant 0 : index
    %233 = vector.load %arg2[%c216, %c0_55] : memref<264x128xf32, #tpu.memory_space<vmem>>, vector<32x1xf32>
    %234 = vector.broadcast %233 : vector<32x1xf32> to vector<32x2xf32>
    %235 = arith.addf %232, %234 : vector<32x2xf32>
    %cst_56 = arith.constant 0.000000e+00 : f32
    %236 = vector.broadcast %cst_56 : f32 to vector<32x2xf32>
    %237 = arith.subf %236, %235 : vector<32x2xf32>
    %238 = math.exp %237 : vector<32x2xf32>
    %cst_57 = arith.constant 1.000000e+00 : f32
    %239 = vector.broadcast %cst_57 : f32 to vector<32x2xf32>
    %240 = arith.addf %239, %238 : vector<32x2xf32>
    %cst_58 = arith.constant 1.000000e+00 : f32
    %241 = vector.broadcast %cst_58 : f32 to vector<32x2xf32>
    %242 = arith.divf %241, %240 : vector<32x2xf32>
    %243 = arith.mulf %235, %242 : vector<32x2xf32>
    %c248 = arith.constant 248 : index
    %c0_59 = arith.constant 0 : index
    %244 = vector.load %arg2[%c248, %c0_59] : memref<264x128xf32, #tpu.memory_space<vmem>>, vector<5x32xf32>
    %cst_60 = arith.constant dense<0.000000e+00> : vector<5x2xf32>
    %245 = tpu.matmul %244, %243, %cst_60 {dimension_numbers = #tpu.dot_dimension_numbers<[1], [0], [0], [1], [0, 0, 1, 1], [], []>} : vector<5x32xf32>, vector<32x2xf32>, vector<5x2xf32> -> vector<5x2xf32>
    %c256 = arith.constant 256 : index
    %c0_61 = arith.constant 0 : index
    %246 = vector.load %arg2[%c256, %c0_61] : memref<264x128xf32, #tpu.memory_space<vmem>>, vector<5x1xf32>
    %247 = vector.broadcast %246 : vector<5x1xf32> to vector<5x2xf32>
    %248 = arith.addf %245, %247 : vector<5x2xf32>
    %c0_62 = arith.constant 0 : index
    %c0_63 = arith.constant 0 : index
    %249 = vector.load %arg6[%c0_62, %c0_63] : memref<5x2xf32, #tpu.memory_space<vmem>>, vector<5x2xf32>
    tpu.vector_store %arg6[%c0_62, %c0_63], %248 {strides = array<i32>} : memref<5x2xf32, #tpu.memory_space<vmem>>, vector<5x2xf32>,
    return
  }
  func.func @transform_0(%arg0: i32) -> i32 {
    %c0_i32 = arith.constant 0 : i32
    %c0_i32_0 = arith.constant 0 : i32
    return %c0_i32 : i32
  }
  func.func @transform_1(%arg0: i32) -> (i32, i32) {
    %c0_i32 = arith.constant 0 : i32
    %c0_i32_0 = arith.constant 0 : i32
    %c0_i32_1 = arith.constant 0 : i32
    return %c0_i32, %c0_i32_0 : i32, i32
  }
  func.func @transform_2(%arg0: i32) -> (i32, i32, i32) {
    %c0_i32 = arith.constant 0 : i32
    %c0_i32_0 = arith.constant 0 : i32
    %c0_i32_1 = arith.constant 0 : i32
    return %c0_i32, %c0_i32_0, %arg0 : i32, i32, i32
  }
  func.func @transform_3(%arg0: i32) -> (i32, i32, i32) {
    %c0_i32 = arith.constant 0 : i32
    %c0_i32_0 = arith.constant 0 : i32
    %c0_i32_1 = arith.constant 0 : i32
    return %c0_i32, %c0_i32_0, %arg0 : i32, i32, i32
  }
  func.func @transform_4(%arg0: i32) -> (i32, i32) {
    %c0_i32 = arith.constant 0 : i32
    %c0_i32_0 = arith.constant 0 : i32
    return %c0_i32, %arg0 : i32, i32
  }
  func.func @transform_5(%arg0: i32) -> (i32, i32) {
    %c0_i32 = arith.constant 0 : i32
    %c0_i32_0 = arith.constant 0 : i32
    return %c0_i32, %arg0 : i32, i32
  }
}

</mosaic_0001>

<bundles_post_ra>
// kernel: forward.1
= control target key start
LH: loop header
LB: loop body
LE: loop exit
PB: predicated region body
PF: predicated region fallthrough
CT: control target
= control target key end

     0   :  { %10 = vsyncpa [#allocation3], 0  ;;  %s1849_s0 = inlined_call_operand.vmem [shape: f32[19], index: 0, kind: input, shape index: {}]   ;;  %s1850_s1 = inlined_call_operand.vmem [shape: f32[264,128], index: 1, kind: input, shape index: {}]   ;;  %s1851_s2 = inlined_call_operand.vmem [shape: f32[1,4,2], index: 2, kind: input, shape index: {}]   ;;  %s1852_s3 = inlined_call_operand.vmem [shape: f32[3,4,2], index: 3, kind: input, shape index: {}]   ;;  %s1853_s4 = inlined_call_operand.vmem [shape: f32[6,2], index: 4, kind: input, shape index: {}]   ;;  %s1854_s5 = inlined_call_operand.vmem [shape: f32[5,2], index: 5, kind: output, shape index: {}]  }
   0x1   :  { %s17_s20 = sshll.u32 %s1849_s0, 4  ;;  %s18_s20 = int_to_ptr.vmem [resolvable:$true] %s17_s20 }
   0x2   :  { %s1524_s21 = scalar_lea.vmem %s18_s20, 16  ;;  %p1529_p1 = scmp.lt.s32.totalorder %s18_s20, %s18_s20 }
   0x3   :  { %p1525_p0 = scmp.ne.s32.totalorder %s18_s20, %s1524_s21  ;;  %p1530_p2 = scmp.lt.s32.totalorder %s1524_s21, %s1524_s21 }
   0x5   :  { %p1531_p3 = por %p1530_p2, %p1529_p1 }
   0x7   :  { %p1532_p4 = pnand %p1531_p3, %p1525_p0 }
   0x9   :  { %1535 = shalt.err (!%p1532_p4)
}
   0xa   :  { %s1538_s22 = smov [#allocation2]  }
   0xb   :  { %20 = dma.vmem_to_smem %s18_s20, 16, %s1538_s22, [#allocation3]  }
   0xc   :  { %1536 = dma.done.wait [#allocation3], 16  }
   0xd   :  { %1537 = vsyncadd [#allocation3], 4294967280 }
   0xe   :  { %32 = sfence }
   0xf   :  { %v51_v0 = vld [vmem:[%s1853_s4] sm:$0x3f]  ;;  %vm63_vm0 = vcmask 1045504   ;;  %v1539_v2 = vmov 0.0   ;;  %vm1540_vm1 = vmmov 0   ;;  %vm59_vm2 = vcmask 48128  }
  0x10   :  { %v52_v1 = vld [vmem:[%s1850_s1] sm:$0xff]  ;;  %1388 = vmatprep.subr.mxu0 %v1539_v2  ;;  %1390 = vmatprep.mubr.msk.f32.mxu0 %vm1540_vm1, %v1539_v2  ;;  %v53_v3 = vld [vmem:[%s1850_s1 + $0x8] sm:$0xff]  ;;  %v1541_v4 = vmov 0   ;;  %s1542_s6 = smov 4   ;;  %s1543_s7 = smov 2   ;;  %v375_v7 = vld [vmem:[%s1850_s1 + $0x38] sm:$0xff] }
  0x11   :  { %1389 = vmatpush3.msk.msra.mxu0 %vm63_vm0, %v51_v0  ;;  %1490 = vset.pattern.permute.xlu0 %v1541_v4  ;;  %v1310_v5 = vld [vmem:[%s1852_s3 + $0x8] sm:$0xf]  ;;  %v1309_v6 = vld [vmem:[%s1852_s3 + $0x4] sm:$0xf]  ;;  %v33_v8 = vld [vmem:[%s1851_s2] sm:$0xf] }
  0x12   :  { %1391 = vmatmul.mubr.msk.f32.vlgmr.msra.gmra.mrb[0].mxu0 %vm59_vm2, %v52_v1  ;;  %56 = vperm.xlu0 %1490, %v53_v3   ;;  %vm216_vm3 = vcmask 1043456   ;;  %vm49_vm4 = vcmask 31744   ;;  %v137_v9 = vld [vmem:[%s1850_s1 + $0x10] sm:$0xff]  ;;  %v290_v10 = vld [vmem:[%s1850_s1 + $0x20] sm:$0xff]  ;;  %vm47_vm5 = vcmask 15360   ;;  %v138_v19 = vld [vmem:[%s1850_s1 + $0x18] sm:$0xff] }
  0x13   :  { %44 = vrot.lane.b32.xlu1 %v1310_v5, %s1542_s6  ;;  %1393 = vmatprep.subr.mxu1 %v1539_v2  ;;  %v34_v12 = vld [vmem:[%s1852_s3] sm:$0xf]  ;;  %vm139_vm6 = vcmask 64512   ;;  %v297_v21 = vld [vmem:[%s1850_s1 + $0x28] sm:$0xff]  ;;  %v374_v29 = vld [vmem:[%s1850_s1 + $0x30] sm:$0xff]  ;;  %s1544_s24 = smov 124  }
  0x14   :  { %1398 = vmatprep.subr.mxu0 %v1539_v2  ;;  %1395 = vmatprep.mubr.msk.f32.mxu1 %vm1540_vm1, %v1539_v2  ;;  %v454_v30 = vld [vmem:[%s1850_s1 + $0x40] sm:$0xff]  ;;  %s1545_s25 = smov 126   ;;  %s1659_s0 = sld [smem:[#allocation2 + $0x3]]  ;;  %v737_v3 = vld [vmem:[%s1850_s1 + $0x68] sm:$0xff]  ;;  %vm942_vm7 = vcmask 130048   ;;  %vm1096_vm8 = vcmask 261120  }
  0x15   :  { %1400 = vmatprep.mubr.msk.f32.mxu0 %vm1540_vm1, %v1539_v2  ;;  %1491 = vset.pattern.permute.xlu1 %v1541_v4  ;;  %s1661_s26 = sld [smem:[#allocation2 + $0x2]]  ;;  %s1663_s27 = sld [smem:[#allocation2 + $0x1]]  ;;  %vm1302_vm9 = vcmask 12288  }
  0x16   :  { %40 = vrot.lane.b32.xlu0 %v1309_v6, %s1543_s7  ;;  %1399 = vmatpush3.msk.msra.mxu0 %vm216_vm3, %v33_v8  ;;  %s542_s4 = sld [smem:[#allocation2]]  ;;  %s1665_s28 = sld [smem:[#allocation2 + $0x7]] }
  0x17   :  { %1401 = vmatmul.mubr.msk.f32.vlgmr.msra.gmra.mrb[2].mxu0 %vm49_vm4, %v137_v9  ;;  %1408 = vmatprep.subr.mxu0 %v1539_v2  ;;  %s1329_s29 = sld [smem:[#allocation2 + $0xa]]  ;;  %s1331_s30 = sld [smem:[#allocation2 + $0xc]] }
  0x18   :  { %1410 = vmatprep.mubr.msk.f32.mxu0 %vm1540_vm1, %v1539_v2  ;;  %293 = vperm.xlu1 %1491, %v290_v10   ;;  %s1667_s8 = sld [smem:[#allocation2 + $0x4]]  ;;  %s1669_s9 = sld [smem:[#allocation2 + $0x5]] }
  0x19   :  { %s1671_s10 = sld [smem:[#allocation2 + $0x6]]  ;;  %s1673_s11 = sld [smem:[#allocation2 + $0x9]] }
  0x1a   :  { %378 = vperm.xlu0 %1490, %v375_v7   ;;  %s1675_s12 = sld [smem:[#allocation2 + $0x8]]  ;;  %s1330_s13 = sld [smem:[#allocation2 + $0xb]]  ;;  %v568_v40 = vstv %s1659_s0 }
  0x1b   :  { %s1332_s14 = sld [smem:[#allocation2 + $0xd]]  ;;  %v557_v41 = vstv %s1661_s26  ;;  %v546_v42 = vstv %s1663_s27  ;;  %s1690_s15 = sld [smem:[#allocation2 + $0xf]] }
  0x1c   :  { %v1680_v43 = vstv %s542_s4  ;;  %v553_v45 = vstv %s1665_s28  ;;  %s1692_s2 = sld [smem:[#allocation2 + $0xe]]  ;;  %s1337_s18 = sld [smem:[#allocation2 + $0x12]] }
  0x1d   :  { %v1683_v47 = vstv %s1329_s29  ;;  %v1685_v48 = vstv %s1331_s30  ;;  %s1336_s3 = sld [smem:[#allocation2 + $0x11]] }
  0x1e   :  { %v549_v50 = vstv %s1667_s8  ;;  %v560_v51 = vstv %s1669_s9 }
  0x1f   :  { %v571_v52 = vstv %s1671_s10  ;;  %v575_v58 = vstv %s1673_s11 }
  0x20   :  { %v564_v59 = vstv %s1675_s12  ;;  %v1697_v60 = vstv %s1330_s13 }
  0x21   :  { %v1699_v61 = vstv %s1332_s14 }
  0x85   :  { %v45_v15 = vpop.permute.xlu1 %44 }
  0x91   :  { %v57_v11 = vpop.permute.xlu0 %56 }
  0x95   :  { %v41_v13 = vpop.permute.xlu0 %40 }
  0x96   :  { %v48_v14 = vsel %vm47_vm5, %v34_v12, %v41_v13 }
  0x97   :  { %v50_v20 = vsel %vm49_vm4, %v48_v14, %v45_v15  ;;  %v294_v25 = vpop.permute.xlu1 %293 }
  0x99   :  { %v379_v37 = vpop.permute.xlu0 %378 }
  0xe5   :  { %v133_v16 = vpop.f32.mrb[0].mxu0 }
  0xe6   :  { %v134_v17 = vadd.f32 %v133_v16, %v57_v11  ;;  %v1392_v18 = vpop.f32.mrb[1].mxu0 }
  0xe8   :  { %1394 = vmatpush3.msra.mxu1 %v134_v17 }
  0xe9   :  { %1396 = vmatmul.mubr.msk.f32.vlgmr.msra.gmra.mrb[0].mxu1 %vm139_vm6, %v138_v19  ;;  %1403 = vmatprep.subr.mxu1 %v1539_v2 }
  0xea   :  { %1404 = vmatpush3.msk.msra.mxu1 %vm216_vm3, %v50_v20  ;;  %1405 = vmatprep.mubr.msk.f32.mxu1 %vm1540_vm1, %v1539_v2  ;;  %v286_v22 = vpop.f32.mrb[2].mxu0 }
  0xeb   :  { %1413 = vmatprep.subr.mxu1 %v1539_v2  ;;  %v1402_v23 = vpop.f32.mrb[3].mxu0 }
  0xed   :  { %1406 = vmatmul.mubr.msk.f32.vlgmr.msra.gmra.mrb[2].mxu1 %vm49_vm4, %v297_v21  ;;  %v1709_v21 = vstv %s1690_s15 }
  0xee   :  { %1415 = vmatprep.mubr.msk.f32.mxu1 %vm1540_vm1, %v1539_v2 }
 0x1bc   :  { %v209_v24 = vpop.f32.mrb[0].mxu1 }
 0x1bd   :  { %v287_v26 = vadd.f32 %v286_v22, %v209_v24  ;;  %v1397_v27 = vpop.f32.mrb[1].mxu1  ;;  %v595_v22 = vstv %s1692_s2 }
 0x1bf   :  { %v1643_v28 = vadd.f32 %v294_v25, %v287_v26 }
 0x1c0   :  { %v1651_v31 = vpop.f32.mrb[2].mxu1 }
 0x1c1   :  { %v1407_v32 = vpop.f32.mrb[3].mxu1  ;;  %1409 = vmatpush3.msra.mxu0 %v1643_v28  ;;  %1414 = vmatpush3.msra.mxu1 %v1651_v31 }
 0x1c2   :  { %1411 = vmatmul.mubr.msk.f32.vlgmr.msra.gmra.mrb[4].mxu0 %vm139_vm6, %v374_v29  ;;  %1416 = vmatmul.mubr.msk.f32.vlgmr.msra.gmra.mrb[4].mxu1 %vm139_vm6, %v454_v30  ;;  %v1716_v29 = vstv %s1337_s18  ;;  %v615_v30 = vstv %s1336_s3  ;;  %v642_v32 = vld [vmem:[%s1850_s1 + $0x48] sm:$0xff] }
 0x1c3   :  { %1425 = vmatprep.mubr.msk.f32.mxu1 %vm139_vm6, %v737_v3  ;;  %1420 = vmatprep.mubr.msk.f32.mxu0 %vm139_vm6, %v642_v32  ;;  %v1073_v32 = vld [vmem:[%s1850_s1 + $0xe0] sm:$0xff] }
 0x295   :  { %v450_v33 = vpop.f32.mrb[4].mxu0  ;;  %v524_v34 = vpop.f32.mrb[4].mxu1 }
 0x296   :  { %535 = vrot.lane.b32.xlu0 %v524_v34, %s1544_s24  ;;  %531 = vrot.lane.b32.xlu1 %v524_v34, %s1545_s25  ;;  %v1417_v35 = vpop.f32.mrb[5].mxu1  ;;  %v1412_v36 = vpop.f32.mrb[5].mxu0  ;;  %v451_v38 = vadd.f32 %v450_v33, %v379_v37  ;;  %v539_v46 = vmul.f32 %v524_v34, %v524_v34 }
 0x298   :  { %v528_v39 = vmul.f32 %v451_v38, %v451_v38  ;;  %v529_v44 = vmul.f32 %v524_v34, %v451_v38  ;;  %v580_v1 = vmul.f32 %v1683_v47, %v539_v46  ;;  %v596_v27 = vmul.f32 %v595_v22, %v539_v46 }
 0x299   :  { %v624_v33 = vmul.f32 %v1716_v29, %v539_v46 }
 0x29a   :  { %v544_v57 = vmul.f32 %v1680_v43, %v528_v39  ;;  %v547_v0 = vmul.f32 %v546_v42, %v529_v44  ;;  %v569_v6 = vmul.f32 %v568_v40, %v529_v44  ;;  %v558_v7 = vmul.f32 %v557_v41, %v529_v44  ;;  %v738_v42 = vld [vmem:[%s1850_s1 + $0x70] sm:$0xff] }
 0x29c   :  { %v581_v11 = vadd.f32 %v580_v1, %v544_v57 }
 0x308   :  { %v536_v49 = vpop.permute.xlu0 %535  ;;  %v532_v53 = vpop.permute.xlu1 %531 }
 0x309   :  { %v538_v54 = vmul.f32 %v536_v49, %v451_v38  ;;  %v534_v55 = vmul.f32 %v532_v53, %v451_v38  ;;  %v540_v56 = vmul.f32 %v532_v53, %v524_v34  ;;  %v541_v62 = vmul.f32 %v536_v49, %v524_v34 }
 0x30b   :  { %v550_v63 = vmul.f32 %v549_v50, %v534_v55  ;;  %v561_v4 = vmul.f32 %v560_v51, %v534_v55  ;;  %v572_v5 = vmul.f32 %v571_v52, %v534_v55  ;;  %v554_v8 = vmul.f32 %v553_v45, %v538_v54  ;;  %v643_v55 = vld [vmem:[%s1850_s1 + $0x50] sm:$0xff] }
 0x30c   :  { %v584_v10 = vmul.f32 %v1697_v60, %v540_v56  ;;  %v576_v13 = vmul.f32 %v575_v58, %v538_v54  ;;  %v565_v15 = vmul.f32 %v564_v59, %v538_v54  ;;  %v588_v16 = vmul.f32 %v1685_v48, %v541_v62  ;;  %v644_v58 = vld [vmem:[%s1850_s1 + $0x58] sm:$0xff] }
 0x30d   :  { %v551_v9 = vadd.f32 %v550_v63, %v547_v0  ;;  %v573_v12 = vadd.f32 %v572_v5, %v569_v6  ;;  %v562_v14 = vadd.f32 %v561_v4, %v558_v7  ;;  %v592_v23 = vmul.f32 %v1699_v61, %v540_v56 }
 0x30e   :  { %v585_v18 = vadd.f32 %v584_v10, %v581_v11  ;;  %v604_v26 = vmul.f32 %v1709_v21, %v540_v56  ;;  %v616_v34 = vmul.f32 %v615_v30, %v540_v56 }
 0x30f   :  { %v555_v17 = vadd.f32 %v554_v8, %v551_v9  ;;  %v577_v19 = vadd.f32 %v576_v13, %v573_v12  ;;  %v566_v20 = vadd.f32 %v565_v15, %v562_v14  ;;  %v914_v12 = vld [vmem:[%s1850_s1 + $0x78] sm:$0xff]  ;;  %v919_v15 = vld [vmem:[%s1850_s1 + $0xa0] sm:$0xff] }
 0x310   :  { %v589_v24 = vadd.f32 %v588_v16, %v585_v18  ;;  %v918_v16 = vld [vmem:[%s1850_s1 + $0x98] sm:$0xff] }
 0x311   :  { %636 = vrot.lane.b32.xlu0 %v577_v19, %s1542_s6  ;;  %632 = vrot.lane.b32.xlu1 %v566_v20, %s1543_s7  ;;  %s1335_s6 = sld [smem:[#allocation2 + $0x10]]  ;;  %v921_v20 = vld [vmem:[%s1850_s1 + $0xb0] sm:$0xff] }
 0x312   :  { %v593_v25 = vadd.f32 %v592_v23, %v589_v24 }
 0x315   :  { %606 = vrot.lane.b32.xlu0 %v604_v26, %s1545_s25  ;;  %598 = vrot.lane.b32.xlu1 %v596_v27, %s1545_s25 }
 0x317   :  { %v1730_v40 = vstv %s1335_s6 }
 0x318   :  { %v612_v46 = vmul.f32 %v1730_v40, %v541_v62 }
 0x319   :  { %626 = vrot.lane.b32.xlu0 %v624_v33, %s1544_s24  ;;  %618 = vrot.lane.b32.xlu1 %v616_v34, %s1545_s25 }
 0x383   :  { %v637_v35 = vpop.permute.xlu0 %636  ;;  %v633_v36 = vpop.permute.xlu1 %632 }
 0x384   :  { %v639_v37 = vsel %vm47_vm5, %v555_v17, %v633_v36  ;;  %v1072_v36 = vld [vmem:[%s1850_s1 + $0xd8] sm:$0xff] }
 0x385   :  { %v640_v38 = vsel %vm49_vm4, %v639_v37, %v637_v35 }
 0x386   :  { %v641_v39 = vadd.f32 %v640_v38, %v1651_v31 }
 0x387   :  { %v599_v41 = vpop.permute.xlu1 %598  ;;  %v607_v45 = vpop.permute.xlu0 %606 }
 0x388   :  { %v601_v44 = vadd.f32 %v599_v41, %v593_v25  ;;  %1423 = vmatprep.subr.mxu1 %v641_v39 }
 0x389   :  { %1424 = vmatpush3.msra.mxu1 %v641_v39 }
 0x38a   :  { %v609_v49 = vadd.f32 %v607_v45, %v601_v44  ;;  %1426 = vmatmul.mubr.msk.f32.vlgmr.msra.gmra.mrb[6].mxu1 %vm139_vm6, %v738_v42 }
 0x38b   :  { %v619_v51 = vpop.permute.xlu1 %618  ;;  %v627_v31 = vpop.permute.xlu0 %626 }
 0x38c   :  { %v613_v50 = vadd.f32 %v612_v46, %v609_v49  ;;  %v1074_v46 = vld [vmem:[%s1850_s1 + $0xe8] sm:$0xff] }
 0x38e   :  { %v621_v52 = vadd.f32 %v619_v51, %v613_v50 }
 0x390   :  { %v629_v53 = vadd.f32 %v627_v31, %v621_v52 }
 0x392   :  { %v1738_v54 = vadd.f32 %v629_v53, %v1643_v28  ;;  %v645_v28 = vld [vmem:[%s1850_s1 + $0x60] sm:$0xff] }
 0x393   :  { %v1223_v53 = vld [vmem:[%s1850_s1 + $0x100] sm:$0x1f] }
 0x394   :  { %1418 = vmatprep.subr.mxu0 %v1738_v54 }
 0x395   :  { %1419 = vmatpush3.msra.mxu0 %v1738_v54 }
 0x396   :  { %1421 = vmatmul.mubr.msk.f32.vlgmr.msra.gmra.mrb[6].mxu0 %vm139_vm6, %v643_v55 }
 0x397   :  { %1432 = vmatprep.mubr.msk.f32.mxu0 %vm942_vm7, %v914_v12 }
 0x45d   :  { %v1427_v56 = vpop.f32.mrb[6].mxu1 }
 0x45e   :  { %828 = vrot.lane.b32.xlu0 %v1427_v56, %s1545_s25  ;;  %v811_v57 = vpop.f32.mrb[7].mxu1  ;;  %v823_v59 = vmul.f32 %v1427_v56, %v1427_v56 }
 0x45f   :  { %826 = vrot.lane.b32.xlu1 %v811_v57, %s1545_s25  ;;  %v822_v62 = vmul.f32 %v811_v57, %v811_v57 }
 0x460   :  { %v861_v63 = vmul.f32 %v823_v59, %v595_v22  ;;  %v901_v13 = vmul.f32 %v823_v59, %v1716_v29  ;;  %v845_v27 = vmul.f32 %v823_v59, %v1683_v47 }
 0x461   :  { %v860_v0 = vmul.f32 %v822_v62, %v595_v22  ;;  %v900_v14 = vmul.f32 %v822_v62, %v1716_v29  ;;  %v920_v22 = vld [vmem:[%s1850_s1 + $0xa8] sm:$0xff]  ;;  %v844_v34 = vmul.f32 %v822_v62, %v1683_v47 }
 0x462   :  { %653 = vperm.xlu0 %1490, %v645_v28  }
 0x463   :  { %648 = vperm.xlu1 %1491, %v644_v58  }
 0x466   :  { %836 = vrot.lane.b32.xlu0 %v1427_v56, %s1544_s24 }
 0x467   :  { %834 = vrot.lane.b32.xlu1 %v811_v57, %s1544_s24 }
 0x469   :  { %v1422_v1 = vpop.f32.mrb[6].mxu0 }
 0x46a   :  { %866 = vrot.lane.b32.xlu0 %v861_v63, %s1545_s25  ;;  %v728_v3 = vpop.f32.mrb[7].mxu0 }
 0x46b   :  { %864 = vrot.lane.b32.xlu1 %v860_v0, %s1545_s25 }
 0x4d0   :  { %v829_v4 = vpop.permute.xlu0 %828 }
 0x4d1   :  { %v833_v5 = vmul.f32 %v1427_v56, %v829_v4  ;;  %v827_v6 = vpop.permute.xlu1 %826 }
 0x4d2   :  { %v832_v7 = vmul.f32 %v827_v6, %v811_v57 }
 0x4d3   :  { %v873_v8 = vmul.f32 %v833_v5, %v1709_v21  ;;  %v889_v10 = vmul.f32 %v833_v5, %v615_v30  ;;  %v849_v38 = vmul.f32 %v833_v5, %v1697_v60  ;;  %v857_v49 = vmul.f32 %v833_v5, %v1699_v61 }
 0x4d4   :  { %v872_v9 = vmul.f32 %v832_v7, %v1709_v21  ;;  %v888_v11 = vmul.f32 %v832_v7, %v615_v30  ;;  %v848_v41 = vmul.f32 %v832_v7, %v1697_v60  ;;  %v856_v60 = vmul.f32 %v832_v7, %v1699_v61 }
 0x4d5   :  { %878 = vrot.lane.b32.xlu0 %v873_v8, %s1545_s25 }
 0x4d6   :  { %876 = vrot.lane.b32.xlu1 %v872_v9, %s1545_s25 }
 0x4d9   :  { %894 = vrot.lane.b32.xlu0 %v889_v10, %s1545_s25 }
 0x4da   :  { %892 = vrot.lane.b32.xlu1 %v888_v11, %s1545_s25 }
 0x4dd   :  { %906 = vrot.lane.b32.xlu0 %v901_v13, %s1544_s24  ;;  %v916_v13 = vld [vmem:[%s1850_s1 + $0x88] sm:$0xff] }
 0x4de   :  { %904 = vrot.lane.b32.xlu1 %v900_v14, %s1544_s24  ;;  %v917_v14 = vld [vmem:[%s1850_s1 + $0x90] sm:$0xff] }
 0x4e1   :  { %v654_v17 = vpop.permute.xlu0 %653  ;;  %929 = vperm.xlu0 %1490, %v919_v15  }
 0x4e2   :  { %v734_v18 = vadd.f32 %v1422_v1, %v654_v17  ;;  %v649_v19 = vpop.permute.xlu1 %648  ;;  %924 = vperm.xlu1 %1491, %v918_v16  }
 0x4e3   :  { %v729_v21 = vadd.f32 %v728_v3, %v649_v19 }
 0x4e4   :  { %v821_v23 = vmul.f32 %v734_v18, %v734_v18 }
 0x4e5   :  { %v820_v24 = vmul.f32 %v729_v21, %v729_v21  ;;  %v837_v25 = vpop.permute.xlu0 %836  ;;  %939 = vperm.xlu0 %1490, %v921_v20  }
 0x4e6   :  { %v843_v26 = vmul.f32 %v821_v23, %v1680_v43  ;;  %v841_v29 = vmul.f32 %v1427_v56, %v837_v25  ;;  %v835_v30 = vpop.permute.xlu1 %834  ;;  %934 = vperm.xlu1 %1491, %v920_v22  }
 0x4e7   :  { %v842_v33 = vmul.f32 %v820_v24, %v1680_v43  ;;  %v840_v35 = vmul.f32 %v835_v30, %v811_v57  ;;  %v1075_v43 = vld [vmem:[%s1850_s1 + $0xf0] sm:$0xff] }
 0x4e8   :  { %v847_v37 = vadd.f32 %v845_v27, %v843_v26  ;;  %v853_v42 = vmul.f32 %v841_v29, %v1685_v48  ;;  %v885_v58 = vmul.f32 %v841_v29, %v1730_v40 }
 0x4e9   :  { %v846_v39 = vadd.f32 %v844_v34, %v842_v33  ;;  %1083 = vperm.xlu0 %1490, %v1073_v32   ;;  %v852_v47 = vmul.f32 %v840_v35, %v1685_v48  ;;  %v867_v48 = vpop.permute.xlu0 %866  ;;  %v884_v61 = vmul.f32 %v840_v35, %v1730_v40  ;;  %v915_v40 = vld [vmem:[%s1850_s1 + $0x80] sm:$0xff] }
 0x4ea   :  { %v851_v44 = vadd.f32 %v849_v38, %v847_v37  ;;  %1078 = vperm.xlu1 %1491, %v1072_v36   ;;  %v865_v55 = vpop.permute.xlu1 %864 }
 0x4eb   :  { %v850_v45 = vadd.f32 %v848_v41, %v846_v39 }
 0x4ec   :  { %v855_v50 = vadd.f32 %v853_v42, %v851_v44 }
 0x4ed   :  { %v854_v51 = vadd.f32 %v852_v47, %v850_v45  ;;  %1093 = vperm.xlu0 %1490, %v1075_v43  }
 0x4ee   :  { %v859_v52 = vadd.f32 %v857_v49, %v855_v50  ;;  %1088 = vperm.xlu1 %1491, %v1074_v46  }
 0x4ef   :  { %v858_v31 = vadd.f32 %v856_v60, %v854_v51 }
 0x4f0   :  { %v871_v56 = vadd.f32 %v867_v48, %v859_v52  ;;  %v1069_v48 = vld [vmem:[%s1850_s1 + $0xc0] sm:$0xff] }
 0x4f1   :  { %v870_v57 = vadd.f32 %v865_v55, %v858_v31  ;;  %v1070_v55 = vld [vmem:[%s1850_s1 + $0xc8] sm:$0xff] }
 0x4f2   :  { %1226 = vperm.xlu1 %1491, %v1223_v53  }
 0x547   :  { %v879_v28 = vpop.permute.xlu0 %878 }
 0x548   :  { %v883_v59 = vadd.f32 %v879_v28, %v871_v56  ;;  %v877_v62 = vpop.permute.xlu1 %876  ;;  %v1071_v56 = vld [vmem:[%s1850_s1 + $0xd0] sm:$0xff] }
 0x549   :  { %v882_v63 = vadd.f32 %v877_v62, %v870_v57  ;;  %v1546_v57 = vmov 0.0|0.0  }
 0x54a   :  { %v887_v0 = vadd.f32 %v885_v58, %v883_v59 }
 0x54b   :  { %v895_v1 = vpop.permute.xlu0 %894  ;;  %v886_v3 = vadd.f32 %v884_v61, %v882_v63 }
 0x54c   :  { %v893_v4 = vpop.permute.xlu1 %892  ;;  %v899_v8 = vadd.f32 %v895_v1, %v887_v0 }
 0x54d   :  { %v898_v5 = vadd.f32 %v893_v4, %v886_v3 }
 0x54f   :  { %v907_v6 = vpop.permute.xlu0 %906 }
 0x550   :  { %v905_v7 = vpop.permute.xlu1 %904  ;;  %v911_v10 = vadd.f32 %v907_v6, %v899_v8 }
 0x551   :  { %v910_v9 = vadd.f32 %v905_v7, %v898_v5 }
 0x553   :  { %v912_v11 = vadd.f32 %v910_v9, %v1738_v54  ;;  %v1068_v54 = vld [vmem:[%s1850_s1 + $0xb8] sm:$0xff] }
 0x554   :  { %1446 = vmatprep.mubr.msk.f32.mxu1 %vm1096_vm8, %v1068_v54 }
 0x555   :  { %v1463_v12 = vpack.c.bf16 %v911_v10, %v912_v11 }
 0x557   :  { %1464 = vmatprep.subr.bf16.mxu0 %v1463_v12 }
 0x558   :  { %1466 = vmatpush3.bf16.msra.mxu0 %v1463_v12 }
 0x559   :  { %1475 = vmatprep.subr.bf16.mxu0 %v1546_v57 }
 0x55b   :  { %1433 = vmatmul.mubr.msk.f32.vlgmr.msra.gmra.mrb[8].mxu0 %vm942_vm7, %v915_v40 }
 0x55c   :  { %1435 = vmatprep.mubr.msk.f32.mxu0 %vm942_vm7, %v916_v13 }
 0x55f   :  { %1436 = vmatmul.mubr.msk.f32.gmra.mrb[10].mxu0 %vm942_vm7, %v917_v14 }
 0x560   :  { %1460 = vmatprep.mubr.msk.f32.mxu0 %vm1540_vm1, %v1539_v2  ;;  %v930_v15 = vpop.permute.xlu0 %929 }
 0x561   :  { %v925_v16 = vpop.permute.xlu1 %924 }
 0x564   :  { %v940_v22 = vpop.permute.xlu0 %939 }
 0x565   :  { %v935_v25 = vpop.permute.xlu1 %934 }
 0x568   :  { %v1084_v28 = vpop.permute.xlu0 %1083 }
 0x569   :  { %v1079_v58 = vpop.permute.xlu1 %1078 }
 0x56c   :  { %v1094_v1 = vpop.permute.xlu0 %1093 }
 0x56d   :  { %v1089_v5 = vpop.permute.xlu1 %1088 }
 0x62e   :  { %v1434_v17 = vpop.f32.mrb[8].mxu0 }
 0x62f   :  { %v1027_v18 = vadd.f32 %v1434_v17, %v930_v15  ;;  %v1021_v19 = vpop.f32.mrb[9].mxu0 }
 0x630   :  { %v1022_v20 = vadd.f32 %v1021_v19, %v925_v16 }
 0x631   :  { %v1041_v21 = vsub.f32 0.0, %v1027_v18 }
 0x632   :  { %v1040_v23 = vsub.f32 0.0, %v1022_v20  ;;  %v1437_v24 = vpop.f32.mrb[10].mxu0 }
 0x633   :  { %v1046_v26 = vmul.f32 1.442695, %v1041_v21  ;;  %v1037_v2 = vadd.f32 %v1437_v24, %v940_v22  ;;  %v1031_v27 = vpop.f32.mrb[11].mxu0 }
 0x634   :  { %v1044_v29 = vmul.f32 1.442695, %v1040_v23  ;;  %v1032_v30 = vadd.f32 %v1031_v27, %v935_v25 }
 0x635   :  { %1492 = vpow2.f32 %v1046_v26  ;;  %v1043_v32 = vsub.f32 0.0, %v1037_v2 }
 0x636   :  { %1494 = vpow2.f32 %v1044_v29  ;;  %v1042_v33 = vsub.f32 0.0, %v1032_v30 }
 0x637   :  { %v1050_v34 = vmul.f32 1.442695, %v1043_v32  ;;  %v1222_v32 = vld [vmem:[%s1850_s1 + $0xf8] sm:$0x1f] }
 0x638   :  { %v1048_v35 = vmul.f32 1.442695, %v1042_v33  ;;  %v1227_v33 = vpop.permute.xlu1 %1226 }
 0x639   :  { %1496 = vpow2.f32 %v1050_v34 }
 0x63a   :  { %1498 = vpow2.f32 %v1048_v35 }
 0x63f   :  { %v1493_v36 = vpop.eup %1492 }
 0x640   :  { %v1495_v37 = vpop.eup %1494  ;;  %v1053_v38 = vadd.f32 1.0, %v1493_v36 }
 0x641   :  { %v1052_v39 = vadd.f32 1.0, %v1495_v37 }
 0x642   :  { %1500 = vrcp.f32 %v1053_v38 }
 0x643   :  { %v1497_v41 = vpop.eup %1496  ;;  %1502 = vrcp.f32 %v1052_v39 }
 0x644   :  { %v1499_v42 = vpop.eup %1498  ;;  %v1055_v44 = vadd.f32 1.0, %v1497_v41 }
 0x645   :  { %v1054_v43 = vadd.f32 1.0, %v1499_v42 }
 0x646   :  { %1504 = vrcp.f32 %v1055_v44 }
 0x647   :  { %1506 = vrcp.f32 %v1054_v43 }
 0x64c   :  { %v1501_v47 = vpop.eup %1500 }
 0x64d   :  { %v1503_v45 = vpop.eup %1502  ;;  %v1065_v46 = vmul.f32 %v1501_v47, %v1027_v18 }
 0x64e   :  { %v1064_v49 = vmul.f32 %v1503_v45, %v1022_v20 }
 0x650   :  { %v1505_v50 = vpop.eup %1504  ;;  %v1467_v60 = vpack.c.bf16 %v1065_v46, %v1064_v49 }
 0x651   :  { %v1507_v51 = vpop.eup %1506  ;;  %v1067_v52 = vmul.f32 %v1505_v50, %v1037_v2 }
 0x652   :  { %v1066_v31 = vmul.f32 %v1507_v51, %v1032_v30  ;;  %1468 = vmatprep.subr.bf16.mxu1 %v1467_v60 }
 0x653   :  { %1470 = vmatpush3.bf16.msra.mxu1 %v1467_v60 }
 0x654   :  { %v1471_v53 = vpack.c.bf16 %v1067_v52, %v1066_v31 }
 0x656   :  { %1472 = vmatprep.subr.bf16.mxu1 %v1471_v53 }
 0x657   :  { %1474 = vmatpush3.bf16.msra.mxu1 %v1471_v53 }
 0x65a   :  { %1447 = vmatmul.mubr.msk.f32.vlgmr.msra.gmra.mrb[8].mxu1 %vm1096_vm8, %v1069_v48 }
 0x65b   :  { %1449 = vmatprep.mubr.msk.f32.mxu1 %vm1096_vm8, %v1070_v55 }
 0x65e   :  { %1450 = vmatmul.mubr.msk.f32.gmra.mrb[10].mxu1 %vm1096_vm8, %v1071_v56 }
 0x72d   :  { %v1448_v59 = vpop.f32.mrb[8].mxu1 }
 0x72e   :  { %v1181_v62 = vadd.f32 %v1448_v59, %v1084_v28  ;;  %v1175_v61 = vpop.f32.mrb[9].mxu1 }
 0x72f   :  { %v1176_v63 = vadd.f32 %v1175_v61, %v1079_v58 }
 0x730   :  { %v1195_v0 = vsub.f32 0.0, %v1181_v62 }
 0x731   :  { %v1194_v3 = vsub.f32 0.0, %v1176_v63  ;;  %v1451_v4 = vpop.f32.mrb[10].mxu1 }
 0x732   :  { %v1200_v6 = vmul.f32 1.442695, %v1195_v0  ;;  %v1191_v7 = vadd.f32 %v1451_v4, %v1094_v1  ;;  %v1185_v8 = vpop.f32.mrb[11].mxu1 }
 0x733   :  { %v1198_v9 = vmul.f32 1.442695, %v1194_v3  ;;  %v1186_v10 = vadd.f32 %v1185_v8, %v1089_v5 }
 0x734   :  { %1508 = vpow2.f32 %v1200_v6  ;;  %v1197_v11 = vsub.f32 0.0, %v1191_v7 }
 0x735   :  { %1510 = vpow2.f32 %v1198_v9  ;;  %v1196_v12 = vsub.f32 0.0, %v1186_v10 }
 0x736   :  { %v1204_v40 = vmul.f32 1.442695, %v1197_v11 }
 0x737   :  { %v1202_v13 = vmul.f32 1.442695, %v1196_v12 }
 0x738   :  { %1512 = vpow2.f32 %v1204_v40 }
 0x739   :  { %1514 = vpow2.f32 %v1202_v13 }
 0x73e   :  { %v1509_v14 = vpop.eup %1508 }
 0x73f   :  { %v1511_v54 = vpop.eup %1510  ;;  %v1207_v15 = vadd.f32 1.0, %v1509_v14 }
 0x740   :  { %v1206_v16 = vadd.f32 1.0, %v1511_v54 }
 0x741   :  { %1516 = vrcp.f32 %v1207_v15 }
 0x742   :  { %v1513_v17 = vpop.eup %1512  ;;  %1518 = vrcp.f32 %v1206_v16 }
 0x743   :  { %v1515_v18 = vpop.eup %1514  ;;  %v1209_v19 = vadd.f32 1.0, %v1513_v17 }
 0x744   :  { %v1208_v20 = vadd.f32 1.0, %v1515_v18 }
 0x745   :  { %1520 = vrcp.f32 %v1209_v19 }
 0x746   :  { %1522 = vrcp.f32 %v1208_v20 }
 0x74b   :  { %v1517_v21 = vpop.eup %1516 }
 0x74c   :  { %v1519_v22 = vpop.eup %1518  ;;  %v1219_v23 = vmul.f32 %v1517_v21, %v1181_v62 }
 0x74d   :  { %v1218_v24 = vmul.f32 %v1519_v22, %v1176_v63 }
 0x74f   :  { %v1521_v25 = vpop.eup %1520  ;;  %v1476_v26 = vpack.c.bf16 %v1219_v23, %v1218_v24 }
 0x750   :  { %v1523_v2 = vpop.eup %1522  ;;  %v1221_v27 = vmul.f32 %v1521_v25, %v1191_v7 }
 0x751   :  { %v1220_v29 = vmul.f32 %v1523_v2, %v1186_v10  ;;  %1477 = vmatpush3.bf16.msra.mxu0 %v1476_v26 }
 0x752   :  { %1478 = vmatprep.subr.bf16.mxu0 %v1546_v57 }
 0x753   :  { %v1479_v30 = vpack.c.bf16 %v1221_v27, %v1220_v29 }
 0x755   :  { %1480 = vmatpush3.bf16.msra.mxu0 %v1479_v30 }
 0x758   :  { %1461 = vmatmul.mubr.msk.f32.vlgmr.msra.gmra.mrb[12].mxu0 %vm1096_vm8, %v1222_v32 }
 0x82b   :  { %v1298_v34 = vpop.f32.mrb[12].mxu0 }
 0x82c   :  { %v1299_v35 = vadd.f32 %v1298_v34, %v1227_v33  ;;  %v1462_v36 = vpop.f32.mrb[13].mxu0 }
 0x82e   :  { %1303 = vst.msk [vmem:[%s1854_s5] sm:$0x1f] %vm1302_vm9, %v1299_v35 }
 0x82f   :  { %1308 = vsyncpa [#allocation3], 1 }

</bundles_post_ra>
